<compile_context>
chip_gen: v7x
topology: tpu7x:2x2x1
jax: 0.10.0
libtpu: 0.0.40
codegen_flags: <defaults>
</compile_context>

<pallas_src>
import functools

import jax
import jax.numpy as jnp
from jax.experimental import pallas as pl
from jax.experimental.pallas import tpu as pltpu


def _compressed_dist_kernel(
    x_ref,            # (TILE_S, D_in)
    w1_ref, b1_ref,   # (D_in, Hp), (1, Hp)
    w2_ref, b2_ref,   # (Hp, D_out), (1, D_out)
    wh_ref, bh_ref,   # (D_out, 2*D_out), (1, 2*D_out)   fused [mean | std] head
    noise_ref,        # (n_samples, TILE_S, D_out)
    samples_ref,      # (n_samples, TILE_S, D_out)  -> (B, n_samples, S, D_out) slab
    mean_ref,         # (TILE_S, D_out)
    std_ref,          # (TILE_S, D_out)
    *, d_out,
):
    x = x_ref[...]

    # hidden = ReLU(Linear) -> ReLU(Linear)
    h = jnp.dot(x, w1_ref[...], preferred_element_type=jnp.float32) + b1_ref[...]
    h = jnp.maximum(h, 0.0)
    h = jnp.dot(h, w2_ref[...], preferred_element_type=jnp.float32) + b2_ref[...]
    h = jnp.maximum(h, 0.0)

    # fused mean/std head: one MXU push, split columns afterwards
    head = jnp.dot(h, wh_ref[...], preferred_element_type=jnp.float32) + bh_ref[...]
    mean = head[:, :d_out]
    s = head[:, d_out:]
    std = s * s + 1e-8

    mean_ref[...] = mean
    std_ref[...] = std

    # reparameterized samples: std * noise + mean, broadcast over n_samples
    samples_ref[...] = std[None, :, :] * noise_ref[...] + mean[None, :, :]


def _pick_tile_s(S, max_rows=512):
    if S <= max_rows:
        return S
    for t in range(max_rows, 0, -1):
        if S % t == 0 and t % 8 == 0:
            return t
    return S


def compressed_dist_forward(reps, params, noise, *, max_tile_rows=512):
    """reps: (B, S, D_in) f32; noise: (n_samples, B, S, D_out) f32.

    Returns (samples, (mean, std)) with samples shaped (B, n_samples, S, D_out),
    matching the PyTorch module's `samples.transpose(0, 1)` (no host transpose:
    the kernel writes samples directly in that layout).
    """
    w1, b1, w2, b2, wm, bm, ws, bs = params
    B, S, D_in = reps.shape
    n_samples = noise.shape[0]
    D_out = wm.shape[1]
    H = w1.shape[1]

    # --- host-side parameter prep (one-time, tiny) ---
    # pad hidden dim to a multiple of 8 (exact: zero cols/bias -> ReLU(0)=0,
    # zero rows of W2 contribute nothing)
    Hp = ((H + 7) // 8) * 8
    if Hp != H:
        w1 = jnp.pad(w1, ((0, 0), (0, Hp - H)))
        b1 = jnp.pad(b1, ((0, 0), (0, Hp - H)))
        w2 = jnp.pad(w2, ((0, Hp - H), (0, 0)))
    # fuse mean/std heads
    wh = jnp.concatenate([wm, ws], axis=1)   # (D_out, 2*D_out)
    bh = jnp.concatenate([bm, bs], axis=1)   # (1, 2*D_out)

    TILE_S = _pick_tile_s(S, max_tile_rows)
    grid = (B, S // TILE_S)

    # --- VMEM budget (generation-aware: stays <= 32 MiB scoped, v7x-safe) ---
    est_bytes = 4 * (
        2 * (TILE_S * D_in)                                            # x (2 bufs)
        + 2 * (D_in * Hp + Hp + Hp * D_out + D_out + 2 * D_out * D_out + 2 * D_out)
        + 4 * (n_samples * TILE_S * D_out)                             # noise + samples
        + 4 * (TILE_S * D_out)                                         # mean + std
        + 2 * TILE_S * (Hp + 2 * D_out)                                # intermediates
    )
    vmem_limit = int(min(max(4 * est_bytes, 16 * 2 ** 20), 32 * 2 ** 20))

    M = B * S
    cost = pl.CostEstimate(
        flops=2 * M * (D_in * Hp + Hp * D_out + D_out * 2 * D_out)
        + 2 * n_samples * M * D_out,
        transcendentals=0,
        bytes_accessed=4 * (
            M * D_in
            + D_in * Hp + Hp + Hp * D_out + D_out + 2 * D_out * D_out + 2 * D_out
            + 2 * n_samples * M * D_out          # noise in + samples out
            + 2 * M * D_out                      # mean + std out
        ),
    )

    def w_spec(shape):  # resident weight/bias (constant block index)
        return pl.BlockSpec(shape, lambda b, s: (0, 0))

    kernel = functools.partial(_compressed_dist_kernel, d_out=D_out)

    samples, mean, std = pl.pallas_call(
        kernel,
        grid=grid,
        in_specs=[
            pl.BlockSpec((None, TILE_S, D_in), lambda b, s: (b, s, 0)),          # x
            w_spec((D_in, Hp)), w_spec((1, Hp)),                                 # w1, b1
            w_spec((Hp, D_out)), w_spec((1, D_out)),                             # w2, b2
            w_spec((D_out, 2 * D_out)), w_spec((1, 2 * D_out)),                  # wh, bh
            pl.BlockSpec((n_samples, None, TILE_S, D_out),
                         lambda b, s: (0, b, s, 0)),                             # noise
        ],
        out_specs=(
            pl.BlockSpec((None, n_samples, TILE_S, D_out),
                         lambda b, s: (b, 0, s, 0)),                             # samples
            pl.BlockSpec((None, TILE_S, D_out), lambda b, s: (b, s, 0)),         # mean
            pl.BlockSpec((None, TILE_S, D_out), lambda b, s: (b, s, 0)),         # std
        ),
        out_shape=(
            jax.ShapeDtypeStruct((B, n_samples, S, D_out), jnp.float32),
            jax.ShapeDtypeStruct((B, S, D_out), jnp.float32),
            jax.ShapeDtypeStruct((B, S, D_out), jnp.float32),
        ),
        compiler_params=pltpu.CompilerParams(
            dimension_semantics=("parallel", "parallel"),
            vmem_limit_bytes=vmem_limit,
        ),
        cost_estimate=cost,
    )(reps, w1, b1, w2, b2, wh, bh, noise)

    return samples, (mean, std)


def init_params(key, input_dim, output_dim):
    hidden_dim = (input_dim + output_dim) // 2
    ks = jax.random.split(key, 8)
    # Deterministic synthetic init (weights stored as (in_features, out_features)).
    w1 = 0.1 * jax.random.normal(ks[0], (input_dim, hidden_dim), jnp.float32)
    b1 = 0.1 * jax.random.normal(ks[1], (1, hidden_dim), jnp.float32)
    w2 = 0.1 * jax.random.normal(ks[2], (hidden_dim, output_dim), jnp.float32)
    b2 = 0.1 * jax.random.normal(ks[3], (1, output_dim), jnp.float32)
    wm = 0.1 * jax.random.normal(ks[4], (output_dim, output_dim), jnp.float32)
    bm = 0.1 * jax.random.normal(ks[5], (1, output_dim), jnp.float32)
    ws = 0.1 * jax.random.normal(ks[6], (output_dim, output_dim), jnp.float32)
    bs = 0.1 * jax.random.normal(ks[7], (1, output_dim), jnp.float32)
    return (w1, b1, w2, b2, wm, bm, ws, bs)


def reference_forward(reps, params, noise):
    # Pure-JAX reference mirroring the PyTorch module.
    w1, b1, w2, b2, wm, bm, ws, bs = params
    h = jnp.maximum(reps @ w1 + b1[0], 0.0)
    h = jnp.maximum(h @ w2 + b2[0], 0.0)
    mean = h @ wm + bm[0]
    std = (h @ ws + bs[0]) ** 2 + 1e-8
    samples = std[None] * noise + mean[None]          # (n_samples, B, S, D_out)
    return jnp.swapaxes(samples, 0, 1), (mean, std)   # (B, n_samples, S, D_out)


if __name__ == "__main__":
    key = jax.random.PRNGKey(0)
    k_params, k_reps, k_noise = jax.random.split(key, 3)

    # Small shapes consistent with the module: batch=2, seq=8,
    # input_dim=32, output_dim=16 (hidden = (32+16)//2 = 24), n_samples=3.
    B, S, D_in, D_out, N_SAMPLES = 2, 8, 32, 16, 3

    params = init_params(k_params, D_in, D_out)
    reps = jax.random.normal(k_reps, (B, S, D_in), jnp.float32)
    noise = jax.random.normal(k_noise, (N_SAMPLES, B, S, D_out), jnp.float32)

    samples, (mean, std) = compressed_dist_forward(reps, params, noise)
    jax.block_until_ready((samples, mean, std))

    # sanity check against pure-JAX reference
    ref_samples, (ref_mean, ref_std) = reference_forward(reps, params, noise)
    assert samples.shape == (B, N_SAMPLES, S, D_out)
    assert mean.shape == (B, S, D_out) and std.shape == (B, S, D_out)
    assert jnp.allclose(samples, ref_samples, atol=1e-5)
    assert jnp.allclose(mean, ref_mean, atol=1e-5)
    assert jnp.allclose(std, ref_std, atol=1e-5)

    print("KERNEL_OK")
</pallas_src>

<mosaic_0001>
module attributes {stable_mosaic.version = 11 : i64} {
  func.func @_compressed_dist_kernel(%arg0: i32, %arg1: i32, %arg2: memref<1x8x32xf32, #tpu.memory_space<vmem>>, %arg3: memref<32x24xf32, #tpu.memory_space<vmem>>, %arg4: memref<1x24xf32, #tpu.memory_space<vmem>>, %arg5: memref<24x16xf32, #tpu.memory_space<vmem>>, %arg6: memref<1x16xf32, #tpu.memory_space<vmem>>, %arg7: memref<16x32xf32, #tpu.memory_space<vmem>>, %arg8: memref<1x32xf32, #tpu.memory_space<vmem>>, %arg9: memref<3x1x8x16xf32, #tpu.memory_space<vmem>>, %arg10: memref<1x3x8x16xf32, #tpu.memory_space<vmem>>, %arg11: memref<1x8x16xf32, #tpu.memory_space<vmem>>, %arg12: memref<1x8x16xf32, #tpu.memory_space<vmem>>) attributes {dimension_semantics = [#tpu.dimension_semantics<parallel>, #tpu.dimension_semantics<parallel>], iteration_bounds = array<i64: 2, 1>, scalar_prefetch = 0 : i64, scratch_operands = 0 : i64, tpu.core_type = #tpu.core_type<tc>, window_params = [{transform_indices = @transform_0, window_bounds = array<i64: 1, 8, 32>}, {pipeline_mode = #tpu.pipeline_mode<synchronous>, transform_indices = @transform_1, window_bounds = array<i64: 32, 24>}, {pipeline_mode = #tpu.pipeline_mode<synchronous>, transform_indices = @transform_2, window_bounds = array<i64: 1, 24>}, {pipeline_mode = #tpu.pipeline_mode<synchronous>, transform_indices = @transform_3, window_bounds = array<i64: 24, 16>}, {pipeline_mode = #tpu.pipeline_mode<synchronous>, transform_indices = @transform_4, window_bounds = array<i64: 1, 16>}, {pipeline_mode = #tpu.pipeline_mode<synchronous>, transform_indices = @transform_5, window_bounds = array<i64: 16, 32>}, {pipeline_mode = #tpu.pipeline_mode<synchronous>, transform_indices = @transform_6, window_bounds = array<i64: 1, 32>}, {transform_indices = @transform_7, window_bounds = array<i64: 3, 1, 8, 16>}, {transform_indices = @transform_8, window_bounds = array<i64: 1, 3, 8, 16>}, {transform_indices = @transform_9, window_bounds = array<i64: 1, 8, 16>}, {transform_indices = @transform_10, window_bounds = array<i64: 1, 8, 16>}]} {
    %c0 = arith.constant 0 : index
    %c0_0 = arith.constant 0 : index
    %c0_1 = arith.constant 0 : index
    %0 = vector.load %arg2[%c0, %c0_0, %c0_1] : memref<1x8x32xf32, #tpu.memory_space<vmem>>, vector<1x8x32xf32>
    %1 = vector.shape_cast %0 : vector<1x8x32xf32> to vector<8x32xf32>
    %c0_2 = arith.constant 0 : index
    %c0_3 = arith.constant 0 : index
    %2 = vector.load %arg3[%c0_2, %c0_3] : memref<32x24xf32, #tpu.memory_space<vmem>>, vector<32x24xf32>
    %cst = arith.constant dense<0.000000e+00> : vector<8x24xf32>
    %3 = tpu.matmul %1, %2, %cst {dimension_numbers = #tpu.dot_dimension_numbers<[1], [0], [0], [1], [0, 0, 1, 1], [], []>} : vector<8x32xf32>, vector<32x24xf32>, vector<8x24xf32> -> vector<8x24xf32>
    %c0_4 = arith.constant 0 : index
    %c0_5 = arith.constant 0 : index
    %4 = vector.load %arg4[%c0_4, %c0_5] : memref<1x24xf32, #tpu.memory_space<vmem>>, vector<1x24xf32>
    %5 = vector.broadcast %4 : vector<1x24xf32> to vector<8x24xf32>
    %6 = arith.addf %3, %5 : vector<8x24xf32>
    %cst_6 = arith.constant 0.000000e+00 : f32
    %7 = vector.broadcast %cst_6 : f32 to vector<8x24xf32>
    %8 = arith.maximumf %6, %7 : vector<8x24xf32>
    %c0_7 = arith.constant 0 : index
    %c0_8 = arith.constant 0 : index
    %9 = vector.load %arg5[%c0_7, %c0_8] : memref<24x16xf32, #tpu.memory_space<vmem>>, vector<24x16xf32>
    %cst_9 = arith.constant dense<0.000000e+00> : vector<8x16xf32>
    %10 = tpu.matmul %8, %9, %cst_9 {dimension_numbers = #tpu.dot_dimension_numbers<[1], [0], [0], [1], [0, 0, 1, 1], [], []>} : vector<8x24xf32>, vector<24x16xf32>, vector<8x16xf32> -> vector<8x16xf32>
    %c0_10 = arith.constant 0 : index
    %c0_11 = arith.constant 0 : index
    %11 = vector.load %arg6[%c0_10, %c0_11] : memref<1x16xf32, #tpu.memory_space<vmem>>, vector<1x16xf32>
    %12 = vector.broadcast %11 : vector<1x16xf32> to vector<8x16xf32>
    %13 = arith.addf %10, %12 : vector<8x16xf32>
    %cst_12 = arith.constant 0.000000e+00 : f32
    %14 = vector.broadcast %cst_12 : f32 to vector<8x16xf32>
    %15 = arith.maximumf %13, %14 : vector<8x16xf32>
    %c0_13 = arith.constant 0 : index
    %c0_14 = arith.constant 0 : index
    %16 = vector.load %arg7[%c0_13, %c0_14] : memref<16x32xf32, #tpu.memory_space<vmem>>, vector<16x32xf32>
    %cst_15 = arith.constant dense<0.000000e+00> : vector<8x32xf32>
    %17 = tpu.matmul %15, %16, %cst_15 {dimension_numbers = #tpu.dot_dimension_numbers<[1], [0], [0], [1], [0, 0, 1, 1], [], []>} : vector<8x16xf32>, vector<16x32xf32>, vector<8x32xf32> -> vector<8x32xf32>
    %c0_16 = arith.constant 0 : index
    %c0_17 = arith.constant 0 : index
    %18 = vector.load %arg8[%c0_16, %c0_17] : memref<1x32xf32, #tpu.memory_space<vmem>>, vector<1x32xf32>
    %19 = vector.broadcast %18 : vector<1x32xf32> to vector<8x32xf32>
    %20 = arith.addf %17, %19 : vector<8x32xf32>
    %21 = vector.extract_strided_slice %20 {offsets = [0, 0], sizes = [8, 16], strides = [1, 1]} : vector<8x32xf32> to vector<8x16xf32>
    %22 = vector.extract_strided_slice %20 {offsets = [0, 16], sizes = [8, 16], strides = [1, 1]} : vector<8x32xf32> to vector<8x16xf32>
    %23 = arith.mulf %22, %22 : vector<8x16xf32>
    %cst_18 = arith.constant 9.99999993E-9 : f32
    %24 = vector.broadcast %cst_18 : f32 to vector<8x16xf32>
    %25 = arith.addf %23, %24 : vector<8x16xf32>
    %c0_19 = arith.constant 0 : index
    %c0_20 = arith.constant 0 : index
    %c0_21 = arith.constant 0 : index
    %26 = vector.load %arg11[%c0_19, %c0_20, %c0_21] : memref<1x8x16xf32, #tpu.memory_space<vmem>>, vector<1x8x16xf32>
    %27 = vector.shape_cast %26 : vector<1x8x16xf32> to vector<8x16xf32>
    %28 = vector.shape_cast %21 : vector<8x16xf32> to vector<1x8x16xf32>
    tpu.vector_store %arg11[%c0_19, %c0_20, %c0_21], %28 {strides = array<i32>} : memref<1x8x16xf32, #tpu.memory_space<vmem>>, vector<1x8x16xf32>,
    %c0_22 = arith.constant 0 : index
    %c0_23 = arith.constant 0 : index
    %c0_24 = arith.constant 0 : index
    %29 = vector.load %arg12[%c0_22, %c0_23, %c0_24] : memref<1x8x16xf32, #tpu.memory_space<vmem>>, vector<1x8x16xf32>
    %30 = vector.shape_cast %29 : vector<1x8x16xf32> to vector<8x16xf32>
    %31 = vector.shape_cast %25 : vector<8x16xf32> to vector<1x8x16xf32>
    tpu.vector_store %arg12[%c0_22, %c0_23, %c0_24], %31 {strides = array<i32>} : memref<1x8x16xf32, #tpu.memory_space<vmem>>, vector<1x8x16xf32>,
    %32 = vector.shape_cast %25 : vector<8x16xf32> to vector<1x8x16xf32>
    %c0_25 = arith.constant 0 : index
    %c0_26 = arith.constant 0 : index
    %c0_27 = arith.constant 0 : index
    %c0_28 = arith.constant 0 : index
    %33 = vector.load %arg9[%c0_25, %c0_26, %c0_27, %c0_28] : memref<3x1x8x16xf32, #tpu.memory_space<vmem>>, vector<3x1x8x16xf32>
    %34 = vector.shape_cast %33 : vector<3x1x8x16xf32> to vector<3x8x16xf32>
    %35 = vector.broadcast %32 : vector<1x8x16xf32> to vector<3x8x16xf32>
    %36 = arith.mulf %35, %34 : vector<3x8x16xf32>
    %37 = vector.shape_cast %21 : vector<8x16xf32> to vector<1x8x16xf32>
    %38 = vector.broadcast %37 : vector<1x8x16xf32> to vector<3x8x16xf32>
    %39 = arith.addf %36, %38 : vector<3x8x16xf32>
    %c0_29 = arith.constant 0 : index
    %c0_30 = arith.constant 0 : index
    %c0_31 = arith.constant 0 : index
    %c0_32 = arith.constant 0 : index
    %40 = vector.load %arg10[%c0_29, %c0_30, %c0_31, %c0_32] : memref<1x3x8x16xf32, #tpu.memory_space<vmem>>, vector<1x3x8x16xf32>
    %41 = vector.shape_cast %40 : vector<1x3x8x16xf32> to vector<3x8x16xf32>
    %42 = vector.shape_cast %39 : vector<3x8x16xf32> to vector<1x3x8x16xf32>
    tpu.vector_store %arg10[%c0_29, %c0_30, %c0_31, %c0_32], %42 {strides = array<i32>} : memref<1x3x8x16xf32, #tpu.memory_space<vmem>>, vector<1x3x8x16xf32>,
    return
  }
  func.func @transform_0(%arg0: i32, %arg1: i32) -> (i32, i32, i32) {
    %c0_i32 = arith.constant 0 : i32
    %c0_i32_0 = arith.constant 0 : i32
    return %arg0, %arg1, %c0_i32 : i32, i32, i32
  }
  func.func @transform_1(%arg0: i32, %arg1: i32) -> (i32, i32) {
    %c0_i32 = arith.constant 0 : i32
    %c0_i32_0 = arith.constant 0 : i32
    %c0_i32_1 = arith.constant 0 : i32
    return %c0_i32, %c0_i32_0 : i32, i32
  }
  func.func @transform_2(%arg0: i32, %arg1: i32) -> (i32, i32) {
    %c0_i32 = arith.constant 0 : i32
    %c0_i32_0 = arith.constant 0 : i32
    %c0_i32_1 = arith.constant 0 : i32
    return %c0_i32, %c0_i32_0 : i32, i32
  }
  func.func @transform_3(%arg0: i32, %arg1: i32) -> (i32, i32) {
    %c0_i32 = arith.constant 0 : i32
    %c0_i32_0 = arith.constant 0 : i32
    %c0_i32_1 = arith.constant 0 : i32
    return %c0_i32, %c0_i32_0 : i32, i32
  }
  func.func @transform_4(%arg0: i32, %arg1: i32) -> (i32, i32) {
    %c0_i32 = arith.constant 0 : i32
    %c0_i32_0 = arith.constant 0 : i32
    %c0_i32_1 = arith.constant 0 : i32
    return %c0_i32, %c0_i32_0 : i32, i32
  }
  func.func @transform_5(%arg0: i32, %arg1: i32) -> (i32, i32) {
    %c0_i32 = arith.constant 0 : i32
    %c0_i32_0 = arith.constant 0 : i32
    %c0_i32_1 = arith.constant 0 : i32
    return %c0_i32, %c0_i32_0 : i32, i32
  }
  func.func @transform_6(%arg0: i32, %arg1: i32) -> (i32, i32) {
    %c0_i32 = arith.constant 0 : i32
    %c0_i32_0 = arith.constant 0 : i32
    %c0_i32_1 = arith.constant 0 : i32
    return %c0_i32, %c0_i32_0 : i32, i32
  }
  func.func @transform_7(%arg0: i32, %arg1: i32) -> (i32, i32, i32, i32) {
    %c0_i32 = arith.constant 0 : i32
    %c0_i32_0 = arith.constant 0 : i32
    %c0_i32_1 = arith.constant 0 : i32
    return %c0_i32, %arg0, %arg1, %c0_i32_0 : i32, i32, i32, i32
  }
  func.func @transform_8(%arg0: i32, %arg1: i32) -> (i32, i32, i32, i32) {
    %c0_i32 = arith.constant 0 : i32
    %c0_i32_0 = arith.constant 0 : i32
    %c0_i32_1 = arith.constant 0 : i32
    return %arg0, %c0_i32, %arg1, %c0_i32_0 : i32, i32, i32, i32
  }
  func.func @transform_9(%arg0: i32, %arg1: i32) -> (i32, i32, i32) {
    %c0_i32 = arith.constant 0 : i32
    %c0_i32_0 = arith.constant 0 : i32
    return %arg0, %arg1, %c0_i32 : i32, i32, i32
  }
  func.func @transform_10(%arg0: i32, %arg1: i32) -> (i32, i32, i32) {
    %c0_i32 = arith.constant 0 : i32
    %c0_i32_0 = arith.constant 0 : i32
    return %arg0, %arg1, %c0_i32 : i32, i32, i32
  }
}

</mosaic_0001>

<bundles_post_ra>
// kernel: tpu_custom_call.1
= control target key start
LH: loop header
LB: loop body
LE: loop exit
PB: predicated region body
PF: predicated region fallthrough
CT: control target
= control target key end

     0   :  { %s1595_s0 = inlined_call_operand.vmem [shape: f32[2,8,32], index: 0, kind: input, shape index: {}]   ;;  %s1596_s1 = inlined_call_operand.vmem [shape: f32[32,24], index: 1, kind: input, shape index: {}]   ;;  %s1597_s2 = inlined_call_operand.vmem [shape: f32[1,24], index: 2, kind: input, shape index: {}]   ;;  %s1598_s3 = inlined_call_operand.vmem [shape: f32[24,16], index: 3, kind: input, shape index: {}]   ;;  %s1599_s4 = inlined_call_operand.vmem [shape: f32[1,16], index: 4, kind: input, shape index: {}]   ;;  %s1600_s5 = inlined_call_operand.vmem [shape: f32[16,32], index: 5, kind: input, shape index: {}]   ;;  %s1601_s6 = inlined_call_operand.vmem [shape: f32[1,32], index: 6, kind: input, shape index: {}]   ;;  %s1602_s7 = inlined_call_operand.vmem [shape: f32[3,2,8,16], index: 7, kind: input, shape index: {}]   ;;  %s1603_s8 = inlined_call_operand.hbm [shape: f32[2,3,8,16], index: 8, kind: output, shape index: {0}]   ;;  %s1604_s9 = inlined_call_operand.hbm [shape: f32[2,8,16], index: 9, kind: output, shape index: {1}]   ;;  %s1605_s10 = inlined_call_operand.hbm [shape: f32[2,8,16], index: 10, kind: output, shape index: {2}]  }
   0x1   :  { %1613 = sst [smem:[#allocation10_spill]] %s1595_s0 }
   0x2   :  { %1614 = sst [smem:[#allocation11_spill]] %s1596_s1 }
   0x3   :  { %1615 = sst [smem:[#allocation12_spill]] %s1597_s2 }
   0x4   :  { %16 = vsyncpa [#allocation4], 0 }
   0x5   :  { %18 = vsyncpa [#allocation4 + $0x1], 0 }
   0x6   :  { %19 = vsyncpa [#allocation6], 0 }
   0x7   :  { %21 = vsyncpa [#allocation6 + $0x1], 0  ;;  %s1333_s13 = smov 0   ;;  %s1335_s14 = smov 0  }
   0x8   :  { %s1337_s15 = smov 0   ;;  %s1339_s16 = smov 0  }
   0x9   :  { %s1341_s17 = smov 0   ;;  %s1343_s18 = smov 0  }
   0xa LB: > { %s1607_s19 = sadd.s32 4294967295, %s1266_s18   ;;  %s1606_s20 = sadd.s32 4294967294, %s1266_s18   ;;  %s1266_s18 = sphi %s1343_s18, %s27_s18   ;;  %s1262_s17 = sphi %s1341_s17, %s1633_s17   ;;  %s1258_s16 = sphi %s1339_s16, %s1632_s16   ;;  %s1254_s15 = sphi %s1337_s15, %s1631_s15   ;;  %s1250_s14 = sphi %s1335_s14, %s1630_s14   ;;  %s1246_s13 = sphi %s1333_s13, %s1629_s13  }
   0xb   : > { %s39_s21 = sadd.s32 1, %s1262_s17  ;;  %s202_s22 = sadd.s32 1, %s1254_s15 }
   0xc   : > { %p41_p0 = scmp.ge.s32.totalorder %s39_s21, 2  ;;  %p209_p1 = scmp.ne.s32.totalorder %s1254_s15, %s1250_s14 }
   0xd   : > { %p210_p2 = scmp.eq.s32.totalorder %s1266_s18, 0  ;;  %p241_p3 = scmp.eq.s32.totalorder %s1607_s19, 1 }
   0xe   : > { %s1635_s21 = smov (%p41_p0, %s39_s21), 0  ;;  %p246_p6 = scmp.ne.s32.totalorder %s1250_s14, %s1246_s13 }
   0xf   : > { %p211_p4 = por %p210_p2, %p209_p1  ;;  %p1374_p5 = por %p241_p3, %p209_p1 }
  0x10   : > { %s197_s24 = ssub.s32 %s1262_s17, %s1635_s21  ;;  %p247_p8 = scmp.eq.s32.totalorder %s1606_s20, 1 }
  0x11   : > { %p200_p7 = scmp.eq.s32.totalorder %s197_s24, 0  ;;  %p983_p10 = scmp.ge.s32.totalorder %s1266_s18, 2 }
  0x12   : > { %p1387_p9 = por %p247_p8, %p246_p6 }
  0x13   : > { %s1385_s25 = scalar_select %p200_p7, %s1254_s15, %s202_s22  }
  0x14   : > { %337 = sbr.rel (%p983_p10) target bundleno = 34 (0x22), region = 40 }
  0x1b   : > { %350 = sbr.rel (!%p211_p4) target bundleno = 34 (0x22), region = 48  ;;  %s352_s27 = sand.u32 (%p211_p4), 1, %s1254_s15  }
  0x1c   : > { %s984_s28 = sshll.u32 (%p211_p4), %s1262_s17, 3  ;;  %s1053_s29 = smul.u32 (%p211_p4), 24, %s352_s27 }
  0x1d   : > { %s357_s12 = scalar_lea.vmem (%p211_p4), %s1602_s7, %s984_s28 }
  0x1e   : > { %v389_v0 = vld [vmem:[%s357_s12] sm:$0xff] (%p211_p4)  ;;  %v391_v1 = vld [vmem:[%s357_s12 + $0x10] sm:$0xff] (%p211_p4)  ;;  %s354_s22 = scalar_lea.vmem (%p211_p4), [#allocation2], %s1053_s29 }
  0x1f   : > { %v393_v2 = vld [vmem:[%s357_s12 + $0x20] sm:$0xff] (%p211_p4)  ;;  %390 = vst [vmem:[%s354_s22] sm:$0xff] (%p211_p4), %v389_v0  ;;  %392 = vst [vmem:[%s354_s22 + $0x8] sm:$0xff] (%p211_p4), %v391_v1 }
  0x20   : > { %394 = vst [vmem:[%s354_s22 + $0x10] sm:$0xff] (%p211_p4), %v393_v2 }
  0x22 PF: > { %p985_p11 = scmp.ge.s32.totalorder %s1266_s18, 1  ;;  %p399_p12 = scmp.lt.s32.totalorder %s1266_s18, 3 }
  0x24   : > { %p400_p13 = pnand %p985_p11, %p399_p12 }
  0x25   : > { %s1618_s1 = sld [smem:[#allocation11_spill]] (!%p400_p13)  ;;  %v1268_v6 = vmov (!%p400_p13), 0.0|0.0   ;;  %vm1269_vm0 = vmmov (!%p400_p13), 0   ;;  %v1270_v9 = vmov (!%p400_p13), 0.0   ;;  %p460_p0 = scmp.lt.s32.totalorder (!%p400_p13), %s1258_s16, 1  ;;  %vm479_vm1 = vcmask (!%p400_p13), 261120  }
  0x26   : > { %403 = sbr.rel (%p400_p13) target bundleno = 961 (0x3c1), region = 86  ;;  %1041 = vmatprep.subr.bf16.mxu0 (!%p400_p13), %v1268_v6  ;;  %1022 = vmatprep.mubr.msk.f32.mxu0 (!%p400_p13), %vm1269_vm0, %v1270_v9  ;;  %s1619_s0 = sld [smem:[#allocation10_spill]] (!%p400_p13)  ;;  %v554_v12 = vld [vmem:[%s1598_s3] sm:$0xff] (!%p400_p13)  ;;  %v555_v13 = vld [vmem:[%s1598_s3 + $0x8] sm:$0xff] (!%p400_p13)  ;;  %v556_v15 = vld [vmem:[%s1598_s3 + $0x10] sm:$0xff] (!%p400_p13)  ;;  %vm564_vm2 = vcmask (!%p400_p13), 195584  }
  0x27   : > { %1047 = vmatprep.subr.bf16.mxu1 (!%p400_p13), %v1268_v6  ;;  %1031 = vmatprep.mubr.msk.f32.mxu1 (!%p400_p13), %vm1269_vm0, %v1270_v9  ;;  %v1048_v14 = vpack.c.bf16 (!%p400_p13), %v555_v13, %v554_v12  ;;  %s1620_s2 = sld [smem:[#allocation12_spill]] (!%p400_p13)  ;;  %v639_v21 = vld [vmem:[%s1600_s5] sm:$0xff] (!%p400_p13)  ;;  %v640_v22 = vld [vmem:[%s1600_s5 + $0x8] sm:$0xff] (!%p400_p13)  ;;  %s1440_s11 = sand.u32 (!%p400_p13), 1, %s1250_s14   ;;  %vm648_vm3 = vcmask (!%p400_p13), 130048  }
  0x28   : > { %v1051_v23 = vpack.c.bf16 (!%p400_p13), %v640_v22, %v639_v21  ;;  %s1608_s12 = smul.u32 (!%p400_p13), 24, %s1440_s11  ;;  %v991_v27 = vld [vmem:[%s1599_s4] ss:$0 sm:$0xff] (!%p400_p13)  ;;  %s1609_s20 = sshll.u32 (!%p400_p13), %s1440_s11, 3 }
  0x29   : > { %1049 = vmatpush3.bf16.msra.mxu1 (!%p400_p13), %v1048_v14  ;;  %v993_v32 = vld [vmem:[%s1601_s6] ss:$0 sm:$0xff] (!%p400_p13)  ;;  %s1612_s30 = sshll.u32 (!%p400_p13), %s1258_s16, 7 }
  0x2a   : > { %1029 = vmatprep.subr.mxu1 (!%p400_p13), %v1270_v9  ;;  %s408_s22 = scalar_lea.vmem (!%p400_p13), [#allocation2], %s1608_s12 }
  0x2b   : > { %v468_v3 = vld [vmem:[%s1618_s1] sm:$0xff] (!%p400_p13)  ;;  %v469_v4 = vld [vmem:[%s1618_s1 + $0x8] sm:$0xff] (!%p400_p13)  ;;  %v470_v5 = vld [vmem:[%s1618_s1 + $0x10] sm:$0xff] (!%p400_p13) }
  0x2c   : > { %v1042_v7 = vpack.c.bf16 (!%p400_p13), %v469_v4, %v468_v3  ;;  %v471_v8 = vld [vmem:[%s1618_s1 + $0x18] sm:$0xff] (!%p400_p13)  ;;  %v732_v25 = vld [vmem:[%s408_s22 + $0x10] sm:$0xff] (!%p400_p13)  ;;  %v731_v26 = vld [vmem:[%s408_s22 + $0x8] sm:$0xff] (!%p400_p13) }
  0x2d   : > { %v1045_v10 = vpack.c.bf16 %v471_v8, %v470_v5  ;;  %s461_s24 = scalar_select %p460_p0, %s1258_s16, 1  ;;  %1030 = vmatpush3.msra.mxu1 %v556_v15  ;;  %v989_v16 = vld [vmem:[%s1620_s2] ss:$0 sm:$0xff] }
  0x2e   : > { %1043 = vmatpush3.bf16.msra.mxu0 %v1042_v7  ;;  %1050 = vmatprep.subr.bf16.mxu1 %v1268_v6  ;;  %v730_v24 = vld [vmem:[%s408_s22] sm:$0xff]  ;;  %s1610_s22 = smov 112  }
  0x2f   : > { %1044 = vmatprep.subr.bf16.mxu0 %v1268_v6  ;;  %s988_s27 = sshll.u32 %s461_s24, 3  ;;  %s1271_s24 = smov 16  }
  0x30   : > { %s466_s29 = scalar_lea.vmem %s1619_s0, %s988_s27  ;;  %736 = vrot.lane.b32.xlu0 %v730_v24, %s1271_s24  ;;  %740 = vrot.lane.b32.xlu1 %v732_v25, %s1271_s24  ;;  %s1621_s27 = sadd.s32 4294967295, %s1266_s18  }
  0x31   : > { %v467_v11 = vld [vmem:[%s466_s29] sm:$0xff]  ;;  %s452_s29 = scalar_lea.vmem [#allocation5], %s1609_s20  ;;  %s1459_s28 = sand.u32 1, %s1621_s27  }
  0x32   : > { %1046 = vmatpush3.bf16.msra.mxu0 %v1045_v10  ;;  %s812_s20 = sshll.u32 %s452_s29, 4  ;;  %s1273_s27 = smov [#allocation5]   ;;  %s1469_s20 = int_to_ptr.vmem [resolvable:$true] %s812_s20 }
  0x33   : > { %s1128_s0 = scalar_lea.vmem %s1469_s20, 128  ;;  %s1132_s1 = sshll.u32 %s1273_s27, 4  ;;  %s1133_s1 = int_to_ptr.vmem [resolvable:$false] %s1132_s1 }
  0x34   : > { %738 = vrot.lane.b32.xlu0 %v731_v26, %s1271_s24  ;;  %p1129_p1 = scmp.ne.s32.totalorder %s1469_s20, %s1128_s0  ;;  %s1134_s12 = scalar_lea.vmem %s1133_s1, 256 }
  0x35   : > { %1023 = vmatmul.mubr.msk.f32.vlgmr.msra.gmra.mrb[0].mxu0 %vm479_vm1, %v467_v11  ;;  %p1135_p4 = scmp.lt.s32.totalorder %s1469_s20, %s1133_s1  ;;  %p1136_p6 = scmp.lt.s32.totalorder %s1134_s12, %s1128_s0 }
  0x36   : > { %p1130_p2 = pnand %p1129_p1, %p1374_p5 }
  0x37   : > { %p1137_p7 = por %p1136_p6, %p1135_p4 }
  0x38   : > { %p1131_p3 = pneg %p1130_p2 }
  0x3a   : > { %p1138_p8 = pnand %p1137_p7, %p1131_p3 }
  0xa2   : > { %v737_v38 = vpop.permute.xlu0 %736  ;;  %v741_v39 = vpop.permute.xlu1 %740 }
  0xa6   : > { %v739_v40 = vpop.permute.xlu0 %738 }
 0x108   : > { %v549_v17 = vpop.f32.mrb[0].mxu0 }
 0x109   : > { %v550_v18 = vadd.f32 %v989_v16, %v549_v17  ;;  %v1024_v19 = vpop.f32.mrb[1].mxu0 }
 0x10b   : > { %v553_v20 = vmax.f32 %v550_v18, 0.0 }
 0x10d   : > { %1032 = vmatmul.mubr.msk.f32.vlgmr.msra.gmra.mrb[0].mxu1 %vm564_vm2, %v553_v20 }
 0x10e   : > { %1038 = vmatprep.mubr.msk.f32.mxu1 %vm1269_vm0, %v1270_v9  ;;  %1052 = vmatpush3.bf16.msra.mxu1 %v1051_v23 }
 0x1e0   : > { %v634_v28 = vpop.f32.mrb[0].mxu1 }
 0x1e1   : > { %v635_v29 = vadd.f32 %v991_v27, %v634_v28  ;;  %v1033_v30 = vpop.f32.mrb[1].mxu1 }
 0x1e3   : > { %v638_v31 = vmax.f32 %v635_v29, 0.0 }
 0x1e5   : > { %1039 = vmatmul.mubr.msk.f32.vlgmr.msra.gmra.mrb[2].mxu1 %vm648_vm3, %v638_v31 }
 0x2b8   : > { %v718_v33 = vpop.f32.mrb[2].mxu1 }
 0x2b9   : > { %v719_v34 = vadd.f32 %v993_v32, %v718_v33  ;;  %v1040_v35 = vpop.f32.mrb[3].mxu1 }
 0x2bb   : > { %v722_v36 = vmul.f32 %v719_v34, %v719_v34  ;;  %749 = vrot.lane.b32.xlu1 %v719_v34, %s1271_s24  ;;  %724 = vst.msk [vmem:[%s452_s29] sm:$0xff] %vm648_vm3, %v719_v34  ;;  %s1467_s24 = scalar_lea.hbm %s1604_s9, %s1612_s30 }
 0x2bd   : > { %v723_v37 = vadd.f32 1e-08, %v722_v36 }
 0x2bf   : > { %726 = vrot.lane.b32.xlu0 %v723_v37, %s1610_s22 }
 0x2c0   : > { %1141 = shalt.err (!%p1138_p8)
}
 0x2c1   : > { %s1142_s29 = scalar_lea.hbm %s1467_s24, 128  ;;  %s1146_s27 = scalar_lea.hbm %s1604_s9, 256 }
 0x2c2   : > { %p1143_p11 = scmp.ne.s32.totalorder %s1467_s24, %s1142_s29  ;;  %p1147_p0 = scmp.lt.u32.totalorder %s1467_s24, %s1604_s9 }
 0x2c3   : > { %p1148_p1 = scmp.lt.u32.totalorder %s1146_s27, %s1142_s29  ;;  %p1150_p3 = scmp.lt.u32.totalorder %s1142_s29, %s1467_s24 }
 0x2c4   : > { %p1144_p12 = pnand %p1143_p11, %p1374_p5 }
 0x2c5   : > { %p1149_p2 = por %p1148_p1, %p1147_p0 }
 0x2c6   : > { %p1145_p13 = pneg %p1144_p12 }
 0x2c7   : > { %p1151_p4 = por %p1150_p3, %p1149_p2 }
 0x2c9   : > { %p1152_p6 = pnand %p1151_p4, %p1145_p13 }
 0x2cb   : > { %1155 = shalt.err (!%p1152_p6)
}
 0x2cc   : > { %s1622_s0 = scalar_lea.sflag [#allocation6], %s1459_s28  ;;  %v745_v41 = vmul.f32 %v737_v38, %v723_v37  ;;  %v746_v42 = vmul.f32 %v739_v40, %v723_v37  ;;  %s1623_s22 = sshll.u32 %s1440_s11, 3  ;;  %v747_v46 = vmul.f32 %v741_v39, %v723_v37 }
 0x2cd   : > { %1057 = dma.vmem_to_hbm [thread:$0]  (%p1374_p5), %s1469_s20, 128, %s1467_s24, %s1622_s0  }
 0x2ce   : > { %s459_s30 = scalar_lea.vmem [#allocation7], %s1623_s22  ;;  %s1624_s29 = smov 112  }
 0x2cf   : > { %s826_s12 = sshll.u32 %s459_s30, 4  ;;  %s1625_s19 = sshll.u32 %s1258_s16, 7  ;;  %s1499_s12 = int_to_ptr.vmem [resolvable:$true] %s826_s12 }
 0x2d0   : > { %s1506_s20 = scalar_lea.hbm %s1605_s10, %s1625_s19  ;;  %s1156_s24 = scalar_lea.vmem %s1499_s12, 128 }
 0x2d1   : > { %p1157_p7 = scmp.ne.s32.totalorder %s1499_s12, %s1156_s24  ;;  %s1274_s0 = smov [#allocation7]  }
 0x2d2   : > { %s1160_s22 = sshll.u32 %s1274_s0, 4  ;;  %s1161_s22 = int_to_ptr.vmem [resolvable:$false] %s1160_s22 }
 0x2d3   : > { %p1158_p8 = pnand %p1157_p7, %p1374_p5  ;;  %s1162_s2 = scalar_lea.vmem %s1161_s22, 256 }
 0x2d4   : > { %p1163_p12 = scmp.lt.s32.totalorder %s1499_s12, %s1161_s22  ;;  %p1164_p13 = scmp.lt.s32.totalorder %s1162_s2, %s1156_s24 }
 0x2d5   : > { %p1159_p11 = pneg %p1158_p8 }
 0x2d6   : > { %p1165_p0 = por %p1164_p13, %p1163_p12 }
 0x2d8   : > { %p1166_p1 = pnand %p1165_p0, %p1159_p11 }
 0x32d   : > { %v750_v43 = vpop.permute.xlu1 %749 }
 0x32e   : > { %v752_v44 = vadd.f32 %v750_v43, %v745_v41  ;;  %v753_v45 = vadd.f32 %v750_v43, %v746_v42  ;;  %v754_v48 = vadd.f32 %v750_v43, %v747_v46 }
 0x330   : > { %758 = vrot.lane.b32.xlu1 %v752_v44, %s1624_s29  ;;  %760 = vrot.lane.b32.xlu0 %v753_v45, %s1624_s29 }
 0x331   : > { %v727_v47 = vpop.permute.xlu0 %726 }
 0x332   : > { %729 = vst.msk [vmem:[%s459_s30] sm:$0xff] %vm648_vm3, %v727_v47 }
 0x333   : > { %1169 = shalt.err (!%p1166_p1)
}
 0x334   : > { %s1170_s30 = scalar_lea.hbm %s1506_s20, 128  ;;  %s1174_s1 = scalar_lea.hbm %s1605_s10, 256 }
 0x335   : > { %p1171_p2 = scmp.ne.s32.totalorder %s1506_s20, %s1170_s30  ;;  %p1175_p6 = scmp.lt.u32.totalorder %s1506_s20, %s1605_s10 }
 0x336   : > { %p1176_p7 = scmp.lt.u32.totalorder %s1174_s1, %s1170_s30  ;;  %p1178_p11 = scmp.lt.u32.totalorder %s1170_s30, %s1506_s20 }
 0x337   : > { %p1172_p3 = pnand %p1171_p2, %p1374_p5 }
 0x338   : > { %p1177_p8 = por %p1176_p7, %p1175_p6 }
 0x339   : > { %p1173_p4 = pneg %p1172_p3 }
 0x33a   : > { %p1179_p12 = por %p1178_p11, %p1177_p8 }
 0x33c   : > { %p1180_p13 = pnand %p1179_p12, %p1173_p4 }
 0x33e   : > { %1183 = shalt.err (!%p1180_p13)
}
 0x33f   : > { %s1626_s2 = scalar_lea.sflag [#allocation6], %s1459_s28  ;;  %762 = vrot.lane.b32.xlu1 %v754_v48, %s1624_s29  ;;  %s1055_s24 = smul.u32 384, %s1258_s16 }
 0x340   : > { %1058 = dma.vmem_to_hbm [thread:$0]  (%p1374_p5), %s1499_s12, 128, %s1506_s20, %s1626_s2  }
 0x341   : > { %s1627_s19 = smul.u32 24, %s1440_s11  ;;  %s1543_s12 = scalar_lea.hbm %s1603_s8, %s1055_s24 }
 0x342   : > { %s771_s16 = scalar_lea.sflag [#allocation4], %s1440_s11  ;;  %s1275_s20 = smov [#allocation3]  }
 0x343   : > { %s445_s27 = scalar_lea.vmem [#allocation3], %s1627_s19  ;;  %s1188_s0 = sshll.u32 %s1275_s20, 4  ;;  %s1189_s0 = int_to_ptr.vmem [resolvable:$false] %s1188_s0 }
 0x344   : > { %s795_s30 = sshll.u32 %s445_s27, 4  ;;  %s1190_s22 = scalar_lea.vmem %s1189_s0, 768  ;;  %s1538_s30 = int_to_ptr.vmem [resolvable:$true] %s795_s30 }
 0x345   : > { %s1184_s29 = scalar_lea.vmem %s1538_s30, 384  ;;  %p1191_p3 = scmp.lt.s32.totalorder %s1538_s30, %s1189_s0 }
 0x346   : > { %p1185_p0 = scmp.ne.s32.totalorder %s1538_s30, %s1184_s29  ;;  %p1192_p4 = scmp.lt.s32.totalorder %s1190_s22, %s1184_s29 }
 0x348   : > { %p1186_p1 = pnand %p1185_p0, %p1374_p5  ;;  %p1193_p6 = por %p1192_p4, %p1191_p3 }
 0x34a   : > { %p1187_p2 = pneg %p1186_p1 }
 0x34c   : > { %p1194_p7 = pnand %p1193_p6, %p1187_p2 }
 0x3a2   : > { %v759_v49 = vpop.permute.xlu1 %758  ;;  %v761_v50 = vpop.permute.xlu0 %760 }
 0x3a3   : > { %767 = vst.msk [vmem:[%s445_s27] sm:$0xff] %vm648_vm3, %v759_v49  ;;  %768 = vst.msk [vmem:[%s445_s27 + $0x8] sm:$0xff] %vm648_vm3, %v761_v50 }
 0x3b1   : > { %v763_v51 = vpop.permute.xlu1 %762 }
 0x3b2   : > { %769 = vst.msk [vmem:[%s445_s27 + $0x10] sm:$0xff] %vm648_vm3, %v763_v51 }
 0x3b3   : > { %1197 = shalt.err (!%p1194_p7)
}
 0x3b4   : > { %s1198_s2 = scalar_lea.hbm %s1543_s12, 384  ;;  %s1202_s27 = scalar_lea.hbm %s1603_s8, 768 }
 0x3b5   : > { %p1199_p8 = scmp.ne.s32.totalorder %s1543_s12, %s1198_s2  ;;  %p1203_p13 = scmp.lt.u32.totalorder %s1543_s12, %s1603_s8 }
 0x3b6   : > { %p1204_p0 = scmp.lt.u32.totalorder %s1202_s27, %s1198_s2  ;;  %p1206_p2 = scmp.lt.u32.totalorder %s1198_s2, %s1543_s12 }
 0x3b7   : > { %p1200_p11 = pnand %p1199_p8, %p1374_p5 }
 0x3b8   : > { %p1205_p1 = por %p1204_p0, %p1203_p13 }
 0x3b9   : > { %p1201_p12 = pneg %p1200_p11 }
 0x3ba   : > { %p1207_p3 = por %p1206_p2, %p1205_p1 }
 0x3bc   : > { %p1208_p4 = pnand %p1207_p3, %p1201_p12 }
 0x3be   : > { %1211 = shalt.err (!%p1208_p4)
}
 0x3bf   : > { %s1276_s29 = smov 128   ;;  %s1277_s20 = smov 8  }
 0x3c0   : > { %1056 = dma.vmem_to_hbm [thread:$0]  (%p1374_p5), %s1538_s30, 384, %s1543_s12, %s771_s16, %s1276_s29, %s1276_s29, %s1277_s20  }
 0x3c1 PF: > { %s838_s0 = sand.u32 1, %s1246_s13   ;;  %p1063_p6 = pnand %p983_p10, %p1387_p9 }
 0x3c2   : > { %s839_s22 = scalar_lea.sflag [#allocation4], %s838_s0 }
 0x3c3   : > { %1237 = dma.done.wait (!%p1063_p6), %s839_s22, 384  }
 0x3c4   : > { %1239 = vsyncadd (!%p1063_p6), %s839_s22, 4294966912  ;;  %s1628_s2 = sadd.s32 4294967294, %s1266_s18  }
 0x3c5   : > { %s847_s24 = sand.u32 1, %s1628_s2  }
 0x3c6   : > { %s848_s19 = scalar_lea.sflag [#allocation6], %s847_s24 }
 0x3c7   : > { %1241 = dma.done.wait (!%p1063_p6), %s848_s19, 256  }
 0x3c8   : > { %1243 = vsyncadd (!%p1063_p6), %s848_s19, 4294967040  ;;  %s27_s18 = sadd.s32 1, %s1266_s18   ;;  %s1629_s13 = smov %s1250_s14 }
 0x3c9   : > { %p24_p5 = scmp.ge.s32.totalorder %s27_s18, 4   ;;  %s1630_s14 = smov %s1254_s15 }
 0x3ca   : > { %s1631_s15 = smov %s1385_s25  ;;  %s1632_s16 = smov %s1262_s17 }
 0x3cb   : > { %s1633_s17 = smov %s1635_s21  ;;  %26 = sbr.rel (!%p24_p5) target bundleno = 10 (0xa), region = 165 }
 0x3d2   :  { %862 = vsyncpa [#allocation4], 1 }
 0x3d3   :  { %864 = vsyncpa [#allocation4 + $0x1], 1 }
 0x3d4   :  { %865 = vsyncpa [#allocation6], 1 }
 0x3d5   :  { %867 = vsyncpa [#allocation6 + $0x1], 1 }

</bundles_post_ra>
